<compile_context>
chip_gen: v7x
topology: tpu7x:2x2x1
jax: 0.10.0
libtpu: 0.0.40
codegen_flags: <defaults>
</compile_context>

<pallas_src>
import jax
import jax.numpy as jnp
from jax.experimental import pallas as pl
from jax.experimental.pallas import tpu as pltpu

# ----------------------------- model dimensions -----------------------------
B, C, H, W = 2, 4, 16, 16
IN_DIM = C * H * W          # 1024
H0, H1 = 128, 64
LATENT = 32
LANE = 128


def _align128(n):
    return ((n + 127) // 128) * 128


# Packed-bias layout: every segment starts on a 128-lane boundary so in-kernel
# slices are lane-aligned.  Order: be0, be1, b_mu|logvar, bd0, bd1, bd2.
_BIAS_SIZES = (H0, H1, 2 * LATENT, H1, H0, IN_DIM)
_BIAS_OFFS = []
_off = 0
for _s in _BIAS_SIZES:
    _BIAS_OFFS.append(_off)
    _off += _align128(_s)
_BIAS_TOTAL = _off

# Packed bf16 weight slabs (all slabs are 128-lane dense):
#   wa = [we0 ; wd1]                         : [IN_DIM + H1, 128]
#   wb = [we1|0 ; (wmu|wlv)|0 ; wd0|0]       : [H0 + H1 + LATENT, 128]
#        (payload in lanes 0:64; row offsets 0, 128, 192 -> multiples of 16,
#         so each segment starts on a bf16 (16,128) tile boundary)
#   wc = wd2                                 : [H0, IN_DIM]
_WA_OFF_E0, _WA_OFF_D1 = 0, IN_DIM
_WB_OFF_E1, _WB_OFF_MULV, _WB_OFF_D0 = 0, H0, H0 + H1
_WB_ROWS = H0 + H1 + LATENT

# Advisory cost hint (review item): the kernel is DMA/launch bound, ~1.2 MFLOP.
_FLOPS = 2 * B * (IN_DIM * H0 + H0 * H1 + H1 * LANE + LATENT * H1
                  + H1 * H0 + H0 * IN_DIM)
_TRANSCENDENTALS = B * (LATENT + IN_DIM)                      # exp + sigmoid
_BYTES = (B * IN_DIM * 4 + B * LATENT * 4                     # x, eps
          + (IN_DIM + H1) * LANE * 2                          # wa (bf16)
          + _WB_ROWS * LANE * 2                               # wb (bf16)
          + H0 * IN_DIM * 2                                   # wc (bf16)
          + _BIAS_TOTAL * 4                                   # biases (f32)
          + B * IN_DIM * 4 + B * LANE * 4)                    # outputs


# --------------------------------- kernel -----------------------------------
def _vae_kernel(x_ref, eps_ref, wa_ref, wb_ref, wc_ref, b_ref,
                recon_ref, mulv_ref):
    f32 = jnp.float32
    bf16 = jnp.bfloat16

    # ---- unpack parameters (static, lane-aligned slices) ----
    we0 = wa_ref[pl.ds(_WA_OFF_E0, IN_DIM), :]                  # [1024, 128]
    wd1 = wa_ref[pl.ds(_WA_OFF_D1, H1), :]                      # [  64, 128]
    we1 = wb_ref[pl.ds(_WB_OFF_E1, H0), pl.ds(0, H1)]           # [ 128,  64]
    wmulv = wb_ref[pl.ds(_WB_OFF_MULV, H1), :]                  # [  64, 128] (mu|lv|0)
    wd0 = wb_ref[pl.ds(_WB_OFF_D0, LATENT), pl.ds(0, H1)]       # [  32,  64]
    wd2 = wc_ref[...]                                           # [ 128,1024]

    be0 = b_ref[:, pl.ds(_BIAS_OFFS[0], H0)]
    be1 = b_ref[:, pl.ds(_BIAS_OFFS[1], H1)]
    bmulv = b_ref[:, pl.ds(_BIAS_OFFS[2], LANE)]                # 128-wide (64 real + 64 zero)
    bd0 = b_ref[:, pl.ds(_BIAS_OFFS[3], H1)]
    bd1 = b_ref[:, pl.ds(_BIAS_OFFS[4], H0)]
    bd2 = b_ref[:, pl.ds(_BIAS_OFFS[5], IN_DIM)]

    x = x_ref[...]                                              # [B, 1024] f32

    # ---- Encoder (bf16 MXU operands, f32 accumulation, f32 VPU math) ----
    h = jnp.dot(x.astype(bf16), we0, preferred_element_type=f32) + be0
    h = jnp.maximum(h, 0.0)
    h = jnp.dot(h.astype(bf16), we1, preferred_element_type=f32) + be1
    h = jnp.maximum(h, 0.0)

    # Fused mu / log_var head, 128-lane padded: mulv = [mu | log_var | zeros].
    mulv = jnp.dot(h.astype(bf16), wmulv, preferred_element_type=f32) + bmulv
    mu = mulv[:, :LATENT]
    lv = mulv[:, LATENT:2 * LATENT]

    # ---- Reparameterization (f32 EUP exp) ----
    z = mu + eps_ref[...] * jnp.exp(0.5 * lv)

    # ---- Decoder ----
    d = jnp.dot(z.astype(bf16), wd0, preferred_element_type=f32) + bd0
    d = jnp.maximum(d, 0.0)
    d = jnp.dot(d.astype(bf16), wd1, preferred_element_type=f32) + bd1
    d = jnp.maximum(d, 0.0)
    logits = jnp.dot(d.astype(bf16), wd2, preferred_element_type=f32) + bd2

    recon_ref[...] = jax.nn.sigmoid(logits).astype(recon_ref.dtype)
    mulv_ref[...] = mulv.astype(mulv_ref.dtype)                 # lane-dense [B,128] store


# -------------------------------- wrapper ------------------------------------
@jax.jit
def basic_vae_forward(x_img, key, packed):
    """x_img: [B, C, H, W] f32, key: PRNG key (fresh per call).

    Returns [recon, mu, log_var] matching Basic_VAE.forward.
    """
    batch = x_img.shape[0]
    x = x_img.reshape(batch, IN_DIM)
    eps = jax.random.normal(key, (batch, LATENT), jnp.float32)

    vmem = pl.BlockSpec(memory_space=pltpu.MemorySpace.VMEM)
    recon, mulv = pl.pallas_call(
        _vae_kernel,
        out_shape=(
            jax.ShapeDtypeStruct((batch, IN_DIM), jnp.float32),
            jax.ShapeDtypeStruct((batch, LANE), jnp.float32),   # mu|logvar|pad
        ),
        in_specs=[vmem] * 6,
        out_specs=(vmem, vmem),
        cost_estimate=pl.CostEstimate(
            flops=_FLOPS,
            transcendentals=_TRANSCENDENTALS,
            bytes_accessed=_BYTES,
        ),
    )(x, eps, packed["wa"], packed["wb"], packed["wc"], packed["biases"])

    mu = mulv[:, :LATENT]
    log_var = mulv[:, LATENT:2 * LATENT]
    return [recon.reshape(x_img.shape), mu, log_var]


# --------------------------- parameter construction --------------------------
def init_packed_params(key):
    keys = jax.random.split(key, 7)

    def lin(k, fan_in, fan_out):
        kw, kb = jax.random.split(k)
        w = jax.random.normal(kw, (fan_in, fan_out), jnp.float32) / jnp.sqrt(fan_in)
        b = jax.random.normal(kb, (fan_out,), jnp.float32) * 0.05
        return w, b

    we0, be0 = lin(keys[0], IN_DIM, H0)
    we1, be1 = lin(keys[1], H0, H1)
    wmu, bmu = lin(keys[2], H1, LATENT)
    wlv, blv = lin(keys[3], H1, LATENT)
    wd0, bd0 = lin(keys[4], LATENT, H1)
    wd1, bd1 = lin(keys[5], H1, H0)
    wd2, bd2 = lin(keys[6], H0, IN_DIM)

    wmulv = jnp.concatenate([wmu, wlv], axis=1)          # [H1, 2*LATENT]
    bmulv = jnp.concatenate([bmu, blv], axis=0)

    # wa: [we0 ; wd1] rows, 128 lanes.
    wa = jnp.concatenate([we0, wd1], axis=0).astype(jnp.bfloat16)

    # wb: lane-dense 128-wide slab; payload in lanes 0:64, zeros elsewhere.
    wb_f32 = jnp.zeros((_WB_ROWS, LANE), jnp.float32)
    wb_f32 = wb_f32.at[_WB_OFF_E1:_WB_OFF_E1 + H0, :H1].set(we1)
    wb_f32 = wb_f32.at[_WB_OFF_MULV:_WB_OFF_MULV + H1, :2 * LATENT].set(wmulv)
    wb_f32 = wb_f32.at[_WB_OFF_D0:_WB_OFF_D0 + LATENT, :H1].set(wd0)
    wb = wb_f32.astype(jnp.bfloat16)

    wc = wd2.astype(jnp.bfloat16)

    biases = jnp.zeros((1, _BIAS_TOTAL), jnp.float32)
    for off, b in zip(_BIAS_OFFS, (be0, be1, bmulv, bd0, bd1, bd2)):
        biases = biases.at[0, off:off + b.shape[0]].set(b)

    return dict(wa=wa, wb=wb, wc=wc, biases=biases)


# ------------------------------ pure-JAX reference ---------------------------
def _vae_reference(x_img, eps, packed):
    batch = x_img.shape[0]
    x = x_img.reshape(batch, IN_DIM)
    wa, wb, wc = packed["wa"], packed["wb"], packed["wc"]
    bias = packed["biases"][0]

    we0 = wa[:IN_DIM]
    wd1 = wa[IN_DIM:IN_DIM + H1]
    we1 = wb[_WB_OFF_E1:_WB_OFF_E1 + H0, :H1]
    wmulv = wb[_WB_OFF_MULV:_WB_OFF_MULV + H1, :2 * LATENT]
    wd0 = wb[_WB_OFF_D0:_WB_OFF_D0 + LATENT, :H1]
    wd2 = wc

    be0 = bias[_BIAS_OFFS[0]:_BIAS_OFFS[0] + H0]
    be1 = bias[_BIAS_OFFS[1]:_BIAS_OFFS[1] + H1]
    bmulv = bias[_BIAS_OFFS[2]:_BIAS_OFFS[2] + 2 * LATENT]
    bd0 = bias[_BIAS_OFFS[3]:_BIAS_OFFS[3] + H1]
    bd1 = bias[_BIAS_OFFS[4]:_BIAS_OFFS[4] + H0]
    bd2 = bias[_BIAS_OFFS[5]:_BIAS_OFFS[5] + IN_DIM]

    def mm(a, w):
        return jnp.dot(a.astype(jnp.bfloat16), w, preferred_element_type=jnp.float32)

    h = jnp.maximum(mm(x, we0) + be0, 0.0)
    h = jnp.maximum(mm(h, we1) + be1, 0.0)
    mulv = mm(h, wmulv) + bmulv
    mu, lv = mulv[:, :LATENT], mulv[:, LATENT:]
    z = mu + eps * jnp.exp(0.5 * lv)
    d = jnp.maximum(mm(z, wd0) + bd0, 0.0)
    d = jnp.maximum(mm(d, wd1) + bd1, 0.0)
    recon = jax.nn.sigmoid(mm(d, wd2) + bd2)
    return recon.reshape(x_img.shape), mu, lv


if __name__ == "__main__":
    root = jax.random.PRNGKey(0)
    k_x, k_eps, k_p = jax.random.split(root, 3)

    x_img = jax.random.normal(k_x, (B, C, H, W), jnp.float32)
    packed = init_packed_params(k_p)

    recon, mu, log_var = basic_vae_forward(x_img, k_eps, packed)
    jax.block_until_ready((recon, mu, log_var))

    assert recon.shape == (B, C, H, W)
    assert mu.shape == (B, LATENT)
    assert log_var.shape == (B, LATENT)

    # Reference uses the same eps as the wrapper (same key, same draw).
    eps = jax.random.normal(k_eps, (B, LATENT), jnp.float32)
    r_ref, mu_ref, lv_ref = _vae_reference(x_img, eps, packed)
    assert jnp.allclose(recon, r_ref, atol=2e-2, rtol=2e-2)
    assert jnp.allclose(mu, mu_ref, atol=2e-2, rtol=2e-2)
    assert jnp.allclose(log_var, lv_ref, atol=2e-2, rtol=2e-2)

    print("KERNEL_OK")
</pallas_src>

<mosaic_0001>
module attributes {stable_mosaic.version = 11 : i64} {
  func.func @_vae_kernel(%arg0: memref<2x1024xf32, #tpu.memory_space<vmem>>, %arg1: memref<2x32xf32, #tpu.memory_space<vmem>>, %arg2: memref<1088x128xbf16, #tpu.memory_space<vmem>>, %arg3: memref<224x128xbf16, #tpu.memory_space<vmem>>, %arg4: memref<128x1024xbf16, #tpu.memory_space<vmem>>, %arg5: memref<1x1664xf32, #tpu.memory_space<vmem>>, %arg6: memref<2x1024xf32, #tpu.memory_space<vmem>>, %arg7: memref<2x128xf32, #tpu.memory_space<vmem>>) attributes {dimension_semantics = [], scalar_prefetch = 0 : i64, scratch_operands = 0 : i64, tpu.core_type = #tpu.core_type<tc>} {
    %c0 = arith.constant 0 : index
    %c0_0 = arith.constant 0 : index
    %0 = vector.load %arg2[%c0, %c0_0] : memref<1088x128xbf16, #tpu.memory_space<vmem>>, vector<1024x128xbf16>
    %c1024 = arith.constant 1024 : index
    %c0_1 = arith.constant 0 : index
    %1 = vector.load %arg2[%c1024, %c0_1] : memref<1088x128xbf16, #tpu.memory_space<vmem>>, vector<64x128xbf16>
    %c0_2 = arith.constant 0 : index
    %c0_3 = arith.constant 0 : index
    %2 = vector.load %arg3[%c0_2, %c0_3] : memref<224x128xbf16, #tpu.memory_space<vmem>>, vector<128x64xbf16>
    %c128 = arith.constant 128 : index
    %c0_4 = arith.constant 0 : index
    %3 = vector.load %arg3[%c128, %c0_4] : memref<224x128xbf16, #tpu.memory_space<vmem>>, vector<64x128xbf16>
    %c192 = arith.constant 192 : index
    %c0_5 = arith.constant 0 : index
    %4 = vector.load %arg3[%c192, %c0_5] : memref<224x128xbf16, #tpu.memory_space<vmem>>, vector<32x64xbf16>
    %c0_6 = arith.constant 0 : index
    %c0_7 = arith.constant 0 : index
    %5 = vector.load %arg4[%c0_6, %c0_7] : memref<128x1024xbf16, #tpu.memory_space<vmem>>, vector<128x1024xbf16>
    %c0_8 = arith.constant 0 : index
    %c0_9 = arith.constant 0 : index
    %6 = vector.load %arg5[%c0_8, %c0_9] : memref<1x1664xf32, #tpu.memory_space<vmem>>, vector<1x128xf32>
    %c0_10 = arith.constant 0 : index
    %c128_11 = arith.constant 128 : index
    %7 = vector.load %arg5[%c0_10, %c128_11] : memref<1x1664xf32, #tpu.memory_space<vmem>>, vector<1x64xf32>
    %c0_12 = arith.constant 0 : index
    %c256 = arith.constant 256 : index
    %8 = vector.load %arg5[%c0_12, %c256] : memref<1x1664xf32, #tpu.memory_space<vmem>>, vector<1x128xf32>
    %c0_13 = arith.constant 0 : index
    %c384 = arith.constant 384 : index
    %9 = vector.load %arg5[%c0_13, %c384] : memref<1x1664xf32, #tpu.memory_space<vmem>>, vector<1x64xf32>
    %c0_14 = arith.constant 0 : index
    %c512 = arith.constant 512 : index
    %10 = vector.load %arg5[%c0_14, %c512] : memref<1x1664xf32, #tpu.memory_space<vmem>>, vector<1x128xf32>
    %c0_15 = arith.constant 0 : index
    %c640 = arith.constant 640 : index
    %11 = vector.load %arg5[%c0_15, %c640] : memref<1x1664xf32, #tpu.memory_space<vmem>>, vector<1x1024xf32>
    %c0_16 = arith.constant 0 : index
    %c0_17 = arith.constant 0 : index
    %12 = vector.load %arg0[%c0_16, %c0_17] : memref<2x1024xf32, #tpu.memory_space<vmem>>, vector<2x1024xf32>
    %13 = arith.truncf %12 : vector<2x1024xf32> to vector<2x1024xbf16>
    %cst = arith.constant dense<0.000000e+00> : vector<2x128xf32>
    %14 = tpu.matmul %13, %0, %cst {dimension_numbers = #tpu.dot_dimension_numbers<[1], [0], [0], [1], [0, 0, 1, 1], [], []>} : vector<2x1024xbf16>, vector<1024x128xbf16>, vector<2x128xf32> -> vector<2x128xf32>
    %15 = vector.broadcast %6 : vector<1x128xf32> to vector<2x128xf32>
    %16 = arith.addf %14, %15 : vector<2x128xf32>
    %cst_18 = arith.constant 0.000000e+00 : f32
    %17 = vector.broadcast %cst_18 : f32 to vector<2x128xf32>
    %18 = arith.maximumf %16, %17 : vector<2x128xf32>
    %19 = arith.truncf %18 : vector<2x128xf32> to vector<2x128xbf16>
    %cst_19 = arith.constant dense<0.000000e+00> : vector<2x64xf32>
    %20 = tpu.matmul %19, %2, %cst_19 {dimension_numbers = #tpu.dot_dimension_numbers<[1], [0], [0], [1], [0, 0, 1, 1], [], []>} : vector<2x128xbf16>, vector<128x64xbf16>, vector<2x64xf32> -> vector<2x64xf32>
    %21 = vector.broadcast %7 : vector<1x64xf32> to vector<2x64xf32>
    %22 = arith.addf %20, %21 : vector<2x64xf32>
    %cst_20 = arith.constant 0.000000e+00 : f32
    %23 = vector.broadcast %cst_20 : f32 to vector<2x64xf32>
    %24 = arith.maximumf %22, %23 : vector<2x64xf32>
    %25 = arith.truncf %24 : vector<2x64xf32> to vector<2x64xbf16>
    %cst_21 = arith.constant dense<0.000000e+00> : vector<2x128xf32>
    %26 = tpu.matmul %25, %3, %cst_21 {dimension_numbers = #tpu.dot_dimension_numbers<[1], [0], [0], [1], [0, 0, 1, 1], [], []>} : vector<2x64xbf16>, vector<64x128xbf16>, vector<2x128xf32> -> vector<2x128xf32>
    %27 = vector.broadcast %8 : vector<1x128xf32> to vector<2x128xf32>
    %28 = arith.addf %26, %27 : vector<2x128xf32>
    %29 = vector.extract_strided_slice %28 {offsets = [0, 0], sizes = [2, 32], strides = [1, 1]} : vector<2x128xf32> to vector<2x32xf32>
    %30 = vector.extract_strided_slice %28 {offsets = [0, 32], sizes = [2, 32], strides = [1, 1]} : vector<2x128xf32> to vector<2x32xf32>
    %c0_22 = arith.constant 0 : index
    %c0_23 = arith.constant 0 : index
    %31 = vector.load %arg1[%c0_22, %c0_23] : memref<2x32xf32, #tpu.memory_space<vmem>>, vector<2x32xf32>
    %cst_24 = arith.constant 5.000000e-01 : f32
    %32 = vector.broadcast %cst_24 : f32 to vector<2x32xf32>
    %33 = arith.mulf %32, %30 : vector<2x32xf32>
    %34 = math.exp %33 : vector<2x32xf32>
    %35 = arith.mulf %31, %34 : vector<2x32xf32>
    %36 = arith.addf %29, %35 : vector<2x32xf32>
    %37 = arith.truncf %36 : vector<2x32xf32> to vector<2x32xbf16>
    %cst_25 = arith.constant dense<0.000000e+00> : vector<2x64xf32>
    %38 = tpu.matmul %37, %4, %cst_25 {dimension_numbers = #tpu.dot_dimension_numbers<[1], [0], [0], [1], [0, 0, 1, 1], [], []>} : vector<2x32xbf16>, vector<32x64xbf16>, vector<2x64xf32> -> vector<2x64xf32>
    %39 = vector.broadcast %9 : vector<1x64xf32> to vector<2x64xf32>
    %40 = arith.addf %38, %39 : vector<2x64xf32>
    %cst_26 = arith.constant 0.000000e+00 : f32
    %41 = vector.broadcast %cst_26 : f32 to vector<2x64xf32>
    %42 = arith.maximumf %40, %41 : vector<2x64xf32>
    %43 = arith.truncf %42 : vector<2x64xf32> to vector<2x64xbf16>
    %cst_27 = arith.constant dense<0.000000e+00> : vector<2x128xf32>
    %44 = tpu.matmul %43, %1, %cst_27 {dimension_numbers = #tpu.dot_dimension_numbers<[1], [0], [0], [1], [0, 0, 1, 1], [], []>} : vector<2x64xbf16>, vector<64x128xbf16>, vector<2x128xf32> -> vector<2x128xf32>
    %45 = vector.broadcast %10 : vector<1x128xf32> to vector<2x128xf32>
    %46 = arith.addf %44, %45 : vector<2x128xf32>
    %cst_28 = arith.constant 0.000000e+00 : f32
    %47 = vector.broadcast %cst_28 : f32 to vector<2x128xf32>
    %48 = arith.maximumf %46, %47 : vector<2x128xf32>
    %49 = arith.truncf %48 : vector<2x128xf32> to vector<2x128xbf16>
    %cst_29 = arith.constant dense<0.000000e+00> : vector<2x1024xf32>
    %50 = tpu.matmul %49, %5, %cst_29 {dimension_numbers = #tpu.dot_dimension_numbers<[1], [0], [0], [1], [0, 0, 1, 1], [], []>} : vector<2x128xbf16>, vector<128x1024xbf16>, vector<2x1024xf32> -> vector<2x1024xf32>
    %51 = vector.broadcast %11 : vector<1x1024xf32> to vector<2x1024xf32>
    %52 = arith.addf %50, %51 : vector<2x1024xf32>
    %53 = arith.negf %52 : vector<2x1024xf32>
    %54 = math.exp %53 : vector<2x1024xf32>
    %cst_30 = arith.constant 1.000000e+00 : f32
    %55 = vector.broadcast %cst_30 : f32 to vector<2x1024xf32>
    %56 = arith.addf %55, %54 : vector<2x1024xf32>
    %57 = arith.divf %55, %56 : vector<2x1024xf32>
    %c0_31 = arith.constant 0 : index
    %c0_32 = arith.constant 0 : index
    %58 = vector.load %arg6[%c0_31, %c0_32] : memref<2x1024xf32, #tpu.memory_space<vmem>>, vector<2x1024xf32>
    tpu.vector_store %arg6[%c0_31, %c0_32], %57 {strides = array<i32>} : memref<2x1024xf32, #tpu.memory_space<vmem>>, vector<2x1024xf32>,
    %c0_33 = arith.constant 0 : index
    %c0_34 = arith.constant 0 : index
    %59 = vector.load %arg7[%c0_33, %c0_34] : memref<2x128xf32, #tpu.memory_space<vmem>>, vector<2x128xf32>
    tpu.vector_store %arg7[%c0_33, %c0_34], %28 {strides = array<i32>} : memref<2x128xf32, #tpu.memory_space<vmem>>, vector<2x128xf32>,
    return
  }
}

</mosaic_0001>

<bundles_post_ra>
// kernel: basic_vae_forward.1
= control target key start
LH: loop header
LB: loop body
LE: loop exit
PB: predicated region body
PF: predicated region fallthrough
CT: control target
= control target key end

     0   :  { %13 = vsyncpa [#allocation3], 0  ;;  %s2553_s0 = inlined_call_operand.vmem [shape: f32[2,1024], index: 0, kind: input, shape index: {}]   ;;  %s2554_s1 = inlined_call_operand.vmem [shape: f32[2,32], index: 1, kind: input, shape index: {}]   ;;  %s2555_s2 = inlined_call_operand.hbm [shape: bf16[1088,128], index: 2, kind: input, shape index: {}]   ;;  %s2556_s3 = inlined_call_operand.vmem [shape: bf16[224,128], index: 3, kind: input, shape index: {}]   ;;  %s2557_s4 = inlined_call_operand.hbm [shape: bf16[128,1024], index: 4, kind: input, shape index: {}]   ;;  %s2558_s5 = inlined_call_operand.vmem [shape: f32[1,1664], index: 5, kind: input, shape index: {}]   ;;  %s2559_s6 = inlined_call_operand.vmem [shape: f32[2,1024], index: 6, kind: output, shape index: {0}]   ;;  %s2560_s7 = inlined_call_operand.vmem [shape: f32[2,128], index: 7, kind: output, shape index: {1}]  }
   0x1   :  { %14 = vsyncpa [#allocation5], 0  ;;  %s2345_s24 = smov [#allocation2]   ;;  %s2297_s28 = scalar_lea.hbm %s2555_s2, 8704 }
   0x2   :  { %s24_s25 = sshll.u32 %s2345_s24, 4  ;;  %p2298_p0 = scmp.ne.s32.totalorder %s2555_s2, %s2297_s28  ;;  %s25_s25 = int_to_ptr.vmem [resolvable:$true] %s24_s25 }
   0x3   :  { %p2301_p1 = scmp.lt.u32.totalorder %s2297_s28, %s2555_s2 }
   0x5   :  { %p2303_p2 = pnand %p2301_p1, %p2298_p0 }
   0x7   :  { %2306 = shalt.err (!%p2303_p2)
}
   0x8   :  { %s2307_s10 = scalar_lea.vmem %s25_s25, 8704  ;;  %p2312_p4 = scmp.lt.s32.totalorder %s25_s25, %s25_s25 }
   0x9   :  { %p2308_p3 = scmp.ne.s32.totalorder %s25_s25, %s2307_s10  ;;  %p2313_p5 = scmp.lt.s32.totalorder %s2307_s10, %s2307_s10 }
   0xb   :  { %p2314_p6 = por %p2313_p5, %p2312_p4 }
   0xd   :  { %p2315_p7 = pnand %p2314_p6, %p2308_p3 }
   0xf   :  { %2318 = shalt.err (!%p2315_p7)
}
  0x10   :  { %s2346_s11 = smov 64   ;;  %s2347_s12 = smov 4  }
  0x11   :  { %30 = dma.hbm_to_vmem [thread:$0]  %s2555_s2, 8704, %s25_s25, [#allocation3], %s2346_s11, %s2346_s11, %s2347_s12  }
  0x12   :  { %s2348_s15 = smov [#allocation4]   ;;  %s2319_s19 = scalar_lea.hbm %s2557_s4, 8192 }
  0x13   :  { %s38_s16 = sshll.u32 %s2348_s15, 4  ;;  %p2320_p8 = scmp.ne.s32.totalorder %s2557_s4, %s2319_s19  ;;  %s39_s16 = int_to_ptr.vmem [resolvable:$true] %s38_s16 }
  0x14   :  { %p2323_p9 = scmp.lt.u32.totalorder %s2319_s19, %s2557_s4 }
  0x16   :  { %p2325_p10 = pnand %p2323_p9, %p2320_p8 }
  0x18   :  { %2328 = shalt.err (!%p2325_p10)
}
  0x19   :  { %s2329_s24 = scalar_lea.vmem %s39_s16, 8192  ;;  %p2334_p12 = scmp.lt.s32.totalorder %s39_s16, %s39_s16 }
  0x1a   :  { %p2330_p11 = scmp.ne.s32.totalorder %s39_s16, %s2329_s24  ;;  %p2335_p13 = scmp.lt.s32.totalorder %s2329_s24, %s2329_s24 }
  0x1c   :  { %p2336_p0 = por %p2335_p13, %p2334_p12 }
  0x1e   :  { %p2337_p1 = pnand %p2336_p0, %p2330_p11 }
  0x20   :  { %2340 = shalt.err (!%p2337_p1)
}
  0x21   :  { %s2349_s2 = smov 512   ;;  %s2350_s25 = smov 32  }
  0x22   :  { %44 = dma.hbm_to_vmem [thread:$0]  %s2557_s4, 8192, %s39_s16, [#allocation5], %s2349_s2, %s2349_s2, %s2350_s25  }
  0x23   :  { %2341 = dma.done.wait [#allocation3], 8704  }
  0x24   :  { %2342 = vsyncadd [#allocation3], 4294958592 }
  0x25   :  { %2343 = dma.done.wait [#allocation5], 8192  }
  0x26   :  { %2344 = vsyncadd [#allocation5], 4294959104  ;;  %v2179_v0 = vld [vmem:[#allocation2 + $0x40] sm:$0xff]   ;;  %v2183_v4 = vld [vmem:[#allocation2 + $0x48] sm:$0xff]   ;;  %v2351_v22 = vmov 1983009808   ;;  %v296_v24 = vlaneseq }
  0x27   :  { %v2180_v1 = vld [vmem:[#allocation2 + $0xc0] sm:$0xff]   ;;  %2006 = vmatprep.subr.bf16.mxu0 %v2179_v0  ;;  %v2184_v5 = vld [vmem:[#allocation2 + $0xc8] sm:$0xff]   ;;  %v2187_v8 = vld [vmem:[#allocation2 + $0x50] sm:$0xff]   ;;  %v294_v23 = vunpack.c.l.s4 %v2351_v22  ;;  %vm2353_vm0 = vmmov 0   ;;  %vm1020_vm1 = vcmask 523264   ;;  %s2354_s17 = smov 96  }
  0x28   :  { %v2181_v2 = vld [vmem:[#allocation2] sm:$0xff]   ;;  %2028 = vmatprep.subr.bf16.mxu1 %v2180_v1  ;;  %v2185_v6 = vld [vmem:[#allocation2 + $0x8] sm:$0xff]   ;;  %v2188_v9 = vld [vmem:[#allocation2 + $0xd0] sm:$0xff]   ;;  %v2420_v30 = vshrl.u32 %v296_v24, 7  ;;  %vm1093_vm2 = vcmask 261120  }
  0x29   :  { %v2182_v3 = vld [vmem:[#allocation2 + $0x80] sm:$0xff]   ;;  %2007 = vmatpush3.bf16.msra.mxu0 %v2181_v2  ;;  %v2186_v7 = vld [vmem:[#allocation2 + $0x88] sm:$0xff]   ;;  %v2189_v10 = vld [vmem:[#allocation2 + $0x10] sm:$0xff]   ;;  %v295_v29 = vunpack.c.0.s8 %v294_v23 }
  0x2a   :  { %2029 = vmatpush3.bf16.msra.mxu1 %v2182_v3  ;;  %2008 = vmatprep.subr.bf16.mxu0 %v2183_v4  ;;  %v2190_v11 = vld [vmem:[#allocation2 + $0x90] sm:$0xff]   ;;  %v2191_v12 = vld [vmem:[#allocation2 + $0x58] sm:$0xff]   ;;  %v2195_v16 = vld [vmem:[#allocation2 + $0x60] sm:$0xff]  }
  0x2b   :  { %2030 = vmatprep.subr.bf16.mxu1 %v2184_v5  ;;  %v2192_v13 = vld [vmem:[#allocation2 + $0xd8] sm:$0xff]   ;;  %v2196_v17 = vld [vmem:[#allocation2 + $0xe0] sm:$0xff]   ;;  %v2199_v20 = vld [vmem:[#allocation2 + $0x68] sm:$0xff]   ;;  %v2423_v35 = vsub.s32 %v295_v29, %v2420_v30 }
  0x2c   :  { %v2193_v14 = vld [vmem:[#allocation2 + $0x18] sm:$0xff]   ;;  %v2197_v18 = vld [vmem:[#allocation2 + $0x20] sm:$0xff]   ;;  %v2200_v21 = vld [vmem:[#allocation2 + $0xe8] sm:$0xff]  }
  0x2d   :  { %2009 = vmatpush3.bf16.msra.mxu0 %v2185_v6  ;;  %v2194_v15 = vld [vmem:[#allocation2 + $0x98] sm:$0xff]   ;;  %v2198_v19 = vld [vmem:[#allocation2 + $0xa0] sm:$0xff]   ;;  %v2201_v25 = vld [vmem:[#allocation2 + $0x28] sm:$0xff]  }
  0x2e   :  { %2031 = vmatpush3.bf16.msra.mxu1 %v2186_v7  ;;  %2010 = vmatprep.subr.bf16.mxu0 %v2187_v8  ;;  %v2202_v26 = vld [vmem:[#allocation2 + $0xa8] sm:$0xff]   ;;  %v2203_v27 = vld [vmem:[#allocation2 + $0x70] sm:$0xff]   ;;  %v2207_v33 = vld [vmem:[#allocation2 + $0x78] sm:$0xff]  }
  0x2f   :  { %2032 = vmatprep.subr.bf16.mxu1 %v2188_v9  ;;  %v2204_v28 = vld [vmem:[#allocation2 + $0xf0] sm:$0xff]   ;;  %v2208_v34 = vld [vmem:[#allocation2 + $0xf8] sm:$0xff]   ;;  %v288_v38 = vld [vmem:[%s2553_s0] sm:$0xff] }
  0x30   :  { %v2205_v31 = vld [vmem:[#allocation2 + $0x30] sm:$0xff]   ;;  %v2209_v36 = vld [vmem:[#allocation2 + $0x38] sm:$0xff]   ;;  %v299_v39 = vrot.slane %v288_v38, %v2423_v35  ;;  %v292_v40 = vcombine.high %v288_v38, %v288_v38  ;;  %v2212_v41 = vld [vmem:[#allocation2 + $0x140] sm:$0xff]  }
  0x31   :  { %2011 = vmatpush3.bf16.msra.mxu0 %v2189_v10  ;;  %v2206_v32 = vld [vmem:[#allocation2 + $0xb0] sm:$0xff]   ;;  %v2210_v37 = vld [vmem:[#allocation2 + $0xb8] sm:$0xff]   ;;  %v2213_v42 = vld [vmem:[#allocation2 + $0x1c0] sm:$0xff]  }
  0x32   :  { %2033 = vmatpush3.bf16.msra.mxu1 %v2190_v11  ;;  %2012 = vmatprep.subr.bf16.mxu0 %v2191_v12  ;;  %v307_v43 = vcombine.high %v299_v39, %v299_v39  ;;  %v306_v44 = vrot.slane %v292_v40, %v2423_v35  ;;  %v334_v45 = vpack.c.bf16 %v299_v39, %v299_v39  ;;  %v2214_v46 = vld [vmem:[#allocation2 + $0x100] sm:$0xff]   ;;  %v2216_v51 = vld [vmem:[#allocation2 + $0x148] sm:$0xff]   ;;  %v2220_v56 = vld [vmem:[#allocation2 + $0x150] sm:$0xff]  }
  0x33   :  { %2034 = vmatprep.subr.bf16.mxu1 %v2192_v13  ;;  %v2215_v49 = vld [vmem:[#allocation2 + $0x180] sm:$0xff]   ;;  %v2217_v53 = vld [vmem:[#allocation2 + $0x1c8] sm:$0xff]   ;;  %v2221_v57 = vld [vmem:[#allocation2 + $0x1d0] sm:$0xff]  }
  0x34   :  { %v335_v47 = vpack.c.bf16 %v307_v43, %v307_v43  ;;  %v308_v48 = vcombine.high %v306_v44, %v306_v44  ;;  %v336_v50 = vpack.c.bf16 %v306_v44, %v306_v44  ;;  %v2218_v54 = vld [vmem:[#allocation2 + $0x108] sm:$0xff]   ;;  %v2222_v58 = vld [vmem:[#allocation2 + $0x110] sm:$0xff]   ;;  %v2224_v60 = vld [vmem:[#allocation2 + $0x158] sm:$0xff]  }
  0x35   :  { %2013 = vmatpush3.bf16.msra.mxu0 %v2193_v14  ;;  %v2219_v55 = vld [vmem:[#allocation2 + $0x188] sm:$0xff]   ;;  %v2223_v59 = vld [vmem:[#allocation2 + $0x190] sm:$0xff]   ;;  %v2225_v61 = vld [vmem:[#allocation2 + $0x1d8] sm:$0xff]  }
  0x36   :  { %2035 = vmatpush3.bf16.msra.mxu1 %v2194_v15  ;;  %2014 = vmatprep.subr.bf16.mxu0 %v2195_v16  ;;  %v337_v52 = vpack.c.bf16 %v308_v48, %v308_v48  ;;  %v2226_v62 = vld [vmem:[#allocation2 + $0x118] sm:$0xff]   ;;  %v2228_v0 = vld [vmem:[#allocation2 + $0x160] sm:$0xff]   ;;  %v2232_v4 = vld [vmem:[#allocation2 + $0x168] sm:$0xff]  }
  0x37   :  { %2036 = vmatprep.subr.bf16.mxu1 %v2196_v17  ;;  %764 = vmatprep.mubr.bf16.mxu0 %v335_v47  ;;  %v2227_v63 = vld [vmem:[#allocation2 + $0x198] sm:$0xff]   ;;  %v2229_v1 = vld [vmem:[#allocation2 + $0x1e0] sm:$0xff]   ;;  %v2233_v5 = vld [vmem:[#allocation2 + $0x1e8] sm:$0xff]  }
  0x38   :  { %804 = vmatprep.mubr.bf16.mxu1 %v337_v52  ;;  %v2230_v2 = vld [vmem:[#allocation2 + $0x120] sm:$0xff]   ;;  %v2234_v6 = vld [vmem:[#allocation2 + $0x128] sm:$0xff]   ;;  %v2236_v8 = vld [vmem:[#allocation2 + $0x170] sm:$0xff]  }
  0x39   :  { %2015 = vmatpush3.bf16.msra.mxu0 %v2197_v18  ;;  %v2231_v3 = vld [vmem:[#allocation2 + $0x1a0] sm:$0xff]   ;;  %v2235_v7 = vld [vmem:[#allocation2 + $0x1a8] sm:$0xff]   ;;  %v2237_v9 = vld [vmem:[#allocation2 + $0x1f0] sm:$0xff]  }
  0x3a   :  { %2037 = vmatpush3.bf16.msra.mxu1 %v2198_v19  ;;  %2016 = vmatprep.subr.bf16.mxu0 %v2199_v20  ;;  %v2238_v10 = vld [vmem:[#allocation2 + $0x130] sm:$0xff]   ;;  %v2240_v12 = vld [vmem:[#allocation2 + $0x178] sm:$0xff]   ;;  %v289_v15 = vld [vmem:[%s2553_s0 + $0x8] sm:$0xff] }
  0x3b   :  { %2038 = vmatprep.subr.bf16.mxu1 %v2200_v21  ;;  %v2239_v11 = vld [vmem:[#allocation2 + $0x1b0] sm:$0xff]   ;;  %v2241_v13 = vld [vmem:[#allocation2 + $0x1f8] sm:$0xff]   ;;  %v316_v17 = vrot.slane %v289_v15, %v2423_v35  ;;  %v309_v18 = vcombine.high %v289_v15, %v289_v15  ;;  %v2254_v38 = vld [vmem:[%s2556_s3 + $0x48] sm:$0xff]  }
  0x3c   :  { %v2242_v14 = vld [vmem:[#allocation2 + $0x138] sm:$0xff]   ;;  %v2247_v29 = vld [vmem:[%s2556_s3 + $0x10] sm:$0xff]   ;;  %v1844_v40 = vld [vmem:[%s2558_s5] ss:$0 sm:$0xff] }
  0x3d   :  { %2017 = vmatpush3.bf16.msra.mxu0 %v2201_v25  ;;  %v2243_v16 = vld [vmem:[#allocation2 + $0x1b8] sm:$0xff]   ;;  %v324_v19 = vcombine.high %v316_v17, %v316_v17  ;;  %v323_v20 = vrot.slane %v309_v18, %v2423_v35  ;;  %v338_v21 = vpack.c.bf16 %v316_v17, %v316_v17 }
  0x3e   :  { %2039 = vmatpush3.bf16.msra.mxu1 %v2202_v26  ;;  %2018 = vmatprep.subr.bf16.mxu0 %v2203_v27  ;;  %v2245_v26 = vld [vmem:[%s2556_s3] sm:$0xff]   ;;  %v2352_v27 = vmov 0.0  }
  0x3f   :  { %2040 = vmatprep.subr.bf16.mxu1 %v2204_v28  ;;  %v339_v22 = vpack.c.bf16 %v324_v19, %v324_v19  ;;  %v325_v23 = vcombine.high %v323_v20, %v323_v20  ;;  %v340_v24 = vpack.c.bf16 %v323_v20, %v323_v20  ;;  %v2246_v28 = vld [vmem:[%s2556_s3 + $0x8] sm:$0xff]  }
  0x41   :  { %2019 = vmatpush3.bf16.msra.mxu0 %v2205_v31  ;;  %v341_v25 = vpack.c.bf16 %v325_v23, %v325_v23  ;;  %v2248_v31 = vld [vmem:[%s2556_s3 + $0x18] sm:$0xff]   ;;  %v1064_v23 = vld [vmem:[%s2554_s1] sm:$0x3] }
  0x42   :  { %2041 = vmatpush3.bf16.msra.mxu1 %v2206_v32  ;;  %2020 = vmatprep.subr.bf16.mxu0 %v2207_v33  ;;  %v2249_v32 = vld [vmem:[%s2556_s3 + $0x20] sm:$0xff]   ;;  %v2250_v33 = vld [vmem:[%s2556_s3 + $0x28] sm:$0xff]  }
  0x43   :  { %2042 = vmatprep.subr.bf16.mxu1 %v2208_v34  ;;  %v2251_v34 = vld [vmem:[%s2556_s3 + $0x30] sm:$0xff]  }
  0x45   :  { %2021 = vmatpush3.bf16.msra.mxu0 %v2209_v36  ;;  %v2252_v36 = vld [vmem:[%s2556_s3 + $0x38] sm:$0xff]  }
  0x46   :  { %2043 = vmatpush3.bf16.msra.mxu1 %v2210_v37  ;;  %2050 = vmatprep.subr.bf16.mxu0 %v2212_v41  ;;  %v2253_v37 = vld [vmem:[%s2556_s3 + $0x40] sm:$0xff]  }
  0x47   :  { %2072 = vmatprep.subr.bf16.mxu1 %v2213_v42 }
  0x48   :  { %765 = vmatmul.mubr.bf16.vlgmr.msra.gmra.mrb[0].mxu0 %v334_v45 }
  0x49   :  { %2051 = vmatpush3.bf16.msra.mxu0 %v2214_v46  ;;  %805 = vmatmul.mubr.bf16.vlgmr.msra.gmra.mrb[0].mxu1 %v336_v50 }
  0x4a   :  { %2052 = vmatprep.subr.bf16.mxu0 %v2216_v51  ;;  %2073 = vmatpush3.bf16.msra.mxu1 %v2215_v49 }
  0x4b   :  { %2074 = vmatprep.subr.bf16.mxu1 %v2217_v53  ;;  %844 = vmatprep.mubr.bf16.mxu0 %v339_v22 }
  0x4c   :  { %884 = vmatprep.mubr.bf16.mxu1 %v341_v25 }
  0x4d   :  { %2053 = vmatpush3.bf16.msra.mxu0 %v2218_v54 }
  0x4e   :  { %2054 = vmatprep.subr.bf16.mxu0 %v2220_v56  ;;  %2075 = vmatpush3.bf16.msra.mxu1 %v2219_v55 }
  0x4f   :  { %2076 = vmatprep.subr.bf16.mxu1 %v2221_v57 }
  0x51   :  { %2055 = vmatpush3.bf16.msra.mxu0 %v2222_v58 }
  0x52   :  { %2056 = vmatprep.subr.bf16.mxu0 %v2224_v60  ;;  %2077 = vmatpush3.bf16.msra.mxu1 %v2223_v59 }
  0x53   :  { %2078 = vmatprep.subr.bf16.mxu1 %v2225_v61 }
  0x55   :  { %2057 = vmatpush3.bf16.msra.mxu0 %v2226_v62 }
  0x56   :  { %2058 = vmatprep.subr.bf16.mxu0 %v2228_v0  ;;  %2079 = vmatpush3.bf16.msra.mxu1 %v2227_v63 }
  0x57   :  { %2080 = vmatprep.subr.bf16.mxu1 %v2229_v1 }
  0x59   :  { %2059 = vmatpush3.bf16.msra.mxu0 %v2230_v2  ;;  %v2255_v2 = vld [vmem:[%s2556_s3 + $0x50] sm:$0xff]  }
  0x5a   :  { %2060 = vmatprep.subr.bf16.mxu0 %v2232_v4  ;;  %2081 = vmatpush3.bf16.msra.mxu1 %v2231_v3  ;;  %v2256_v3 = vld [vmem:[%s2556_s3 + $0x58] sm:$0xff]   ;;  %v1909_v4 = vld [vmem:[%s2558_s5 + $0x1] ss:$0 sm:$0xff] }
  0x5b   :  { %2082 = vmatprep.subr.bf16.mxu1 %v2233_v5 }
  0x5d   :  { %2061 = vmatpush3.bf16.msra.mxu0 %v2234_v6 }
  0x5e   :  { %2062 = vmatprep.subr.bf16.mxu0 %v2236_v8  ;;  %2083 = vmatpush3.bf16.msra.mxu1 %v2235_v7 }
  0x5f   :  { %2084 = vmatprep.subr.bf16.mxu1 %v2237_v9 }
  0x61   :  { %2063 = vmatpush3.bf16.msra.mxu0 %v2238_v10 }
  0x62   :  { %2064 = vmatprep.subr.bf16.mxu0 %v2240_v12  ;;  %2085 = vmatpush3.bf16.msra.mxu1 %v2239_v11  ;;  %v2257_v12 = vld [vmem:[%s2556_s3 + $0x60] sm:$0xff]  }
  0x63   :  { %2086 = vmatprep.subr.bf16.mxu1 %v2241_v13  ;;  %v1918_v13 = vld [vmem:[%s2558_s5 + $0x2] ss:$0 sm:$0xff] }
  0x65   :  { %2065 = vmatpush3.bf16.msra.mxu0 %v2242_v14 }
  0x66   :  { %2087 = vmatpush3.bf16.msra.mxu1 %v2243_v16  ;;  %2116 = vmatprep.subr.bf16.mxu0 %v2352_v27 }
  0x67   :  { %2136 = vmatprep.subr.bf16.mxu1 %v2352_v27 }
  0x68   :  { %845 = vmatmul.mubr.bf16.vlgmr.msra.gmra.mrb[4].mxu0 %v338_v21  ;;  %v2258_v21 = vld [vmem:[%s2556_s3 + $0x68] sm:$0xff]  }
  0x69   :  { %885 = vmatmul.mubr.bf16.vlgmr.msra.gmra.mrb[4].mxu1 %v340_v24  ;;  %2117 = vmatpush3.bf16.msra.mxu0 %v2245_v26 }
  0x6a   :  { %2118 = vmatprep.subr.bf16.mxu0 %v2352_v27  ;;  %2132 = vmatprep.mubr.msk.bf16.mxu0 %vm2353_vm0, %v2352_v27 }
  0x6b   :  { %2144 = vmatprep.mubr.msk.bf16.mxu1 %vm2353_vm0, %v2352_v27  ;;  %2137 = vmatpush3.bf16.msra.mxu1 %v2253_v37  ;;  %v219_v37 = vld [vmem:[#allocation4 + $0x8] sm:$0xff] }
  0x6c   :  { %2138 = vmatprep.subr.bf16.mxu1 %v2352_v27 }
  0x6d   :  { %2119 = vmatpush3.bf16.msra.mxu0 %v2246_v28  ;;  %v2259_v28 = vld [vmem:[#allocation2 + $0x200] sm:$0xff]  }
  0x6e   :  { %2120 = vmatprep.subr.bf16.mxu0 %v2352_v27 }
  0x6f   :  { %2139 = vmatpush3.bf16.msra.mxu1 %v2254_v38 }
  0x70   :  { %2140 = vmatprep.subr.bf16.mxu1 %v2352_v27 }
  0x71   :  { %2121 = vmatpush3.bf16.msra.mxu0 %v2247_v29 }
  0x72   :  { %2122 = vmatprep.subr.bf16.mxu0 %v2352_v27 }
  0x73   :  { %2141 = vmatpush3.bf16.msra.mxu1 %v2255_v2  ;;  %v1924_v2 = vld [vmem:[%s2558_s5 + $0x3] ss:$0 sm:$0xff] }
  0x74   :  { %2142 = vmatprep.subr.bf16.mxu1 %v2352_v27 }
  0x75   :  { %2123 = vmatpush3.bf16.msra.mxu0 %v2248_v31  ;;  %v2260_v31 = vld [vmem:[#allocation2 + $0x208] sm:$0xff]  }
  0x76   :  { %2124 = vmatprep.subr.bf16.mxu0 %v2352_v27 }
  0x77   :  { %2143 = vmatpush3.bf16.msra.mxu1 %v2256_v3 }
  0x78   :  { %2148 = vmatprep.subr.bf16.mxu1 %v2352_v27 }
  0x79   :  { %2125 = vmatpush3.bf16.msra.mxu0 %v2249_v32  ;;  %v2261_v32 = vld [vmem:[#allocation2 + $0x210] sm:$0xff]  }
  0x7a   :  { %2126 = vmatprep.subr.bf16.mxu0 %v2352_v27 }
  0x7d   :  { %2127 = vmatpush3.bf16.msra.mxu0 %v2250_v33  ;;  %v2262_v33 = vld [vmem:[#allocation2 + $0x218] sm:$0xff]  }
  0x7e   :  { %2128 = vmatprep.subr.bf16.mxu0 %v2352_v27 }
  0x81   :  { %2129 = vmatpush3.bf16.msra.mxu0 %v2251_v34  ;;  %v218_v34 = vld [vmem:[#allocation4] sm:$0xff] }
  0x82   :  { %2130 = vmatprep.subr.bf16.mxu0 %v2352_v27 }
  0x85   :  { %2131 = vmatpush3.bf16.msra.mxu0 %v2252_v36  ;;  %v222_v36 = vld [vmem:[#allocation4 + $0x20] sm:$0xff] }
  0x86   :  { %v1934_v38 = vcombine.low %v218_v34, %v222_v36 }
 0x11b   :  { %v2022_v39 = vpop.f32.mrb[0].mxu0 }
 0x11c   :  { %v2023_v41 = vpop.f32.mrb[1].mxu0  ;;  %v2044_v42 = vpop.f32.mrb[0].mxu1 }
 0x11d   :  { %v2024_v43 = vadd.f32 %v2023_v41, %v2022_v39  ;;  %v2025_v44 = vpop.f32.mrb[2].mxu0  ;;  %v2045_v45 = vpop.f32.mrb[1].mxu1  ;;  %v1935_v39 = vcombine.high %v218_v34, %v222_v36  ;;  %v226_v41 = vld [vmem:[#allocation4 + $0x40] sm:$0xff] }
 0x11e   :  { %v2026_v46 = vpop.f32.mrb[3].mxu0  ;;  %v2046_v48 = vadd.f32 %v2045_v45, %v2044_v42  ;;  %v2047_v49 = vpop.f32.mrb[2].mxu1  ;;  %v230_v42 = vld [vmem:[#allocation4 + $0x60] sm:$0xff] }
 0x11f   :  { %v767_v47 = vadd.f32 %v2024_v43, %v1844_v40  ;;  %v2048_v50 = vpop.f32.mrb[3].mxu1  ;;  %v223_v40 = vld [vmem:[#allocation4 + $0x28] sm:$0xff]  ;;  %v1943_v45 = vcombine.high %v226_v41, %v230_v42  ;;  %1575 = vmatprep.subr.bf16.mxu0 %v1935_v39  ;;  %v1942_v46 = vcombine.low %v226_v41, %v230_v42 }
 0x120   :  { %v1936_v43 = vcombine.low %v219_v37, %v223_v40  ;;  %v1937_v44 = vcombine.high %v219_v37, %v223_v40  ;;  %v242_v50 = vld [vmem:[#allocation4 + $0xc0] sm:$0xff]  ;;  %v275_v39 = vld [vmem:[#allocation4 + $0x1c8] sm:$0xff] }
 0x121   :  { %v807_v51 = vadd.f32 %v2046_v48, %v767_v47  ;;  %v234_v47 = vld [vmem:[#allocation4 + $0x80] sm:$0xff]  ;;  %v279_v41 = vld [vmem:[#allocation4 + $0x1e8] sm:$0xff] }
 0x122   :  { %v274_v37 = vld [vmem:[#allocation4 + $0x1c0] sm:$0xff] }
 0x13b   :  { %v2066_v52 = vpop.f32.mrb[4].mxu0 }
 0x13c   :  { %v2067_v53 = vpop.f32.mrb[5].mxu0  ;;  %v2088_v54 = vpop.f32.mrb[4].mxu1 }
 0x13d   :  { %v2068_v55 = vadd.f32 %v2067_v53, %v2066_v52  ;;  %v2069_v56 = vpop.f32.mrb[6].mxu0  ;;  %v2089_v57 = vpop.f32.mrb[5].mxu1 }
 0x13e   :  { %v2070_v58 = vpop.f32.mrb[7].mxu0  ;;  %v2090_v60 = vadd.f32 %v2089_v57, %v2088_v54  ;;  %v2091_v61 = vpop.f32.mrb[6].mxu1  ;;  %v250_v54 = vld [vmem:[#allocation4 + $0x100] sm:$0xff] }
 0x13f   :  { %v847_v59 = vadd.f32 %v2068_v55, %v807_v51  ;;  %v2092_v62 = vpop.f32.mrb[7].mxu1  ;;  %v246_v51 = vld [vmem:[#allocation4 + $0xe0] sm:$0xff] }
 0x140   :  { %v1959_v52 = vcombine.high %v242_v50, %v246_v51  ;;  %v1958_v53 = vcombine.low %v242_v50, %v246_v51  ;;  %v254_v55 = vld [vmem:[#allocation4 + $0x120] sm:$0xff]  ;;  %v225_v50 = vld [vmem:[#allocation4 + $0x38] sm:$0xff] }
 0x141   :  { %v887_v63 = vadd.f32 %v2090_v60, %v847_v59  ;;  %v1967_v56 = vcombine.high %v250_v54, %v254_v55  ;;  %v1966_v57 = vcombine.low %v250_v54, %v254_v55  ;;  %v258_v58 = vld [vmem:[#allocation4 + $0x140] sm:$0xff] }
 0x142   :  { %v262_v59 = vld [vmem:[#allocation4 + $0x160] sm:$0xff] }
 0x143   :  { %v892_v0 = vmax.f32 %v887_v63, 0.0  ;;  %v1975_v60 = vcombine.high %v258_v58, %v262_v59  ;;  %v1974_v61 = vcombine.low %v258_v58, %v262_v59  ;;  %v266_v62 = vld [vmem:[#allocation4 + $0x180] sm:$0xff]  ;;  %v232_v59 = vld [vmem:[#allocation4 + $0x70] sm:$0xff] }
 0x144   :  { %v270_v63 = vld [vmem:[#allocation4 + $0x1a0] sm:$0xff] }
 0x145   :  { %v893_v1 = vpack.c.bf16 %v892_v0, %v892_v0  ;;  %v1983_v0 = vcombine.high %v266_v62, %v270_v63 }
 0x147   :  { %2133 = vmatmul.mubr.bf16.vlgmr.msra.gmra.mrb[8].mxu0 %v893_v1  ;;  %v1982_v1 = vcombine.low %v266_v62, %v270_v63 }
 0x148   :  { %1576 = vmatpush1.bf16.msra.mxu0 %v1934_v38  ;;  %v278_v38 = vld [vmem:[#allocation4 + $0x1e0] sm:$0xff] }
 0x149   :  { %1577 = vmatprep.subr.bf16.mxu0 %v1943_v45  ;;  %v1991_v40 = vcombine.high %v274_v37, %v278_v38  ;;  %v1990_v42 = vcombine.low %v274_v37, %v278_v38  ;;  %v220_v45 = vld [vmem:[#allocation4 + $0x10] sm:$0xff] }
 0x14a   :  { %v268_v38 = vld [vmem:[#allocation4 + $0x190] sm:$0xff] }
 0x14c   :  { %1578 = vmatpush1.bf16.msra.mxu0 %v1942_v46  ;;  %v224_v46 = vld [vmem:[#allocation4 + $0x30] sm:$0xff] }
 0x21a   :  { %v982_v5 = vpop.f32.mrb[8].mxu0 }
 0x21b   :  { %v983_v6 = vadd.f32 %v1909_v4, %v982_v5  ;;  %v2134_v7 = vpop.f32.mrb[9].mxu0 }
 0x21c   :  { %v985_v8 = vpop.f32.mrb[10].mxu0  ;;  %v227_v7 = vld [vmem:[#allocation4 + $0x48] sm:$0xff] }
 0x21d   :  { %v988_v9 = vmax.f32 %v983_v6, 0.0  ;;  %v2135_v10 = vpop.f32.mrb[11].mxu0  ;;  %v231_v8 = vld [vmem:[#allocation4 + $0x68] sm:$0xff] }
 0x21f   :  { %v989_v11 = vpack.c.bf16 %v988_v9, %v988_v9 }
 0x221   :  { %2145 = vmatmul.mubr.msk.bf16.vlgmr.msra.gmra.mrb[8].mxu1 %vm1020_vm1, %v989_v11 }
 0x222   :  { %2152 = vmatprep.mubr.msk.bf16.mxu1 %vm2353_vm0, %v2352_v27  ;;  %2149 = vmatpush3.bf16.msra.mxu1 %v2257_v12  ;;  %v1945_v12 = vcombine.high %v227_v7, %v231_v8 }
 0x223   :  { %2150 = vmatprep.subr.bf16.mxu1 %v2352_v27 }
 0x226   :  { %2151 = vmatpush3.bf16.msra.mxu1 %v2258_v21  ;;  %v251_v21 = vld [vmem:[#allocation4 + $0x108] sm:$0xff] }
 0x227   :  { %2156 = vmatprep.subr.bf16.mxu1 %v2352_v27 }
 0x2f4   :  { %v1058_v14 = vpop.f32.mrb[8].mxu1 }
 0x2f5   :  { %v1059_v15 = vadd.f32 %v1918_v13, %v1058_v14  ;;  %v2146_v16 = vpop.f32.mrb[9].mxu1  ;;  %v235_v13 = vld [vmem:[#allocation4 + $0x88] sm:$0xff] }
 0x2f6   :  { %v1061_v17 = vpop.f32.mrb[10].mxu1  ;;  %v239_v14 = vld [vmem:[#allocation4 + $0xa8] sm:$0xff] }
 0x2f7   :  { %v1065_v18 = vmul.f32 0.5, %v1059_v15  ;;  %1833 = vst [vmem:[%s2560_s7] sm:$0x3] %v1059_v15  ;;  %v2147_v19 = vpop.f32.mrb[11].mxu1  ;;  %v1953_v16 = vcombine.high %v235_v13, %v239_v14  ;;  %v243_v17 = vld [vmem:[#allocation4 + $0xc8] sm:$0xff] }
 0x2f8   :  { %v1952_v19 = vcombine.low %v235_v13, %v239_v14  ;;  %v245_v13 = vld [vmem:[#allocation4 + $0xd8] sm:$0xff] }
 0x2f9   :  { %v1066_v20 = vmul.f32 1.442695, %v1065_v18  ;;  %v247_v18 = vld [vmem:[#allocation4 + $0xe8] sm:$0xff]  ;;  %v249_v14 = vld [vmem:[#allocation4 + $0xf8] sm:$0xff] }
 0x2fb   :  { %2263 = vpow2.f32 %v1066_v20  ;;  %v1961_v20 = vcombine.high %v243_v17, %v247_v18 }
 0x305   :  { %v2264_v22 = vpop.eup %2263 }
 0x306   :  { %1069 = vrot.lane.b32.xlu0 %v2264_v22, %s2354_s17  ;;  %v255_v22 = vld [vmem:[#allocation4 + $0x128] sm:$0xff] }
 0x378   :  { %v1070_v24 = vpop.permute.xlu0 %1069 }
 0x379   :  { %v1072_v25 = vmul.f32 %v1070_v24, %v1064_v23  ;;  %v1960_v23 = vcombine.low %v243_v17, %v247_v18  ;;  %v1969_v24 = vcombine.high %v251_v21, %v255_v22  ;;  %v1965_v18 = vcombine.high %v245_v13, %v249_v14 }
 0x37b   :  { %v1073_v26 = vadd.f32 %v1072_v25, %v1059_v15  ;;  %v1944_v15 = vcombine.low %v227_v7, %v231_v8  ;;  %v259_v25 = vld [vmem:[#allocation4 + $0x148] sm:$0xff] }
 0x37d   :  { %v1074_v29 = vpack.c.bf16 %v1073_v26, %v1073_v26  ;;  %v263_v26 = vld [vmem:[#allocation4 + $0x168] sm:$0xff] }
 0x37f   :  { %2153 = vmatmul.mubr.msk.bf16.vlgmr.msra.gmra.mrb[12].mxu1 %vm1093_vm2, %v1074_v29  ;;  %v1977_v29 = vcombine.high %v259_v25, %v263_v26 }
 0x380   :  { %2157 = vmatpush3.bf16.msra.mxu1 %v2259_v28  ;;  %2164 = vmatprep.mubr.msk.bf16.mxu1 %vm2353_vm0, %v2352_v27  ;;  %v1968_v28 = vcombine.low %v251_v21, %v255_v22  ;;  %v253_v21 = vld [vmem:[#allocation4 + $0x118] sm:$0xff] }
 0x381   :  { %2158 = vmatprep.subr.bf16.mxu1 %v2352_v27  ;;  %v257_v22 = vld [vmem:[#allocation4 + $0x138] sm:$0xff] }
 0x384   :  { %2159 = vmatpush3.bf16.msra.mxu1 %v2260_v31  ;;  %v267_v31 = vld [vmem:[#allocation4 + $0x188] sm:$0xff] }
 0x385   :  { %2160 = vmatprep.subr.bf16.mxu1 %v2352_v27 }
 0x388   :  { %2161 = vmatpush3.bf16.msra.mxu1 %v2261_v32  ;;  %v271_v32 = vld [vmem:[#allocation4 + $0x1a8] sm:$0xff] }
 0x389   :  { %2162 = vmatprep.subr.bf16.mxu1 %v2352_v27  ;;  %v238_v27 = vld [vmem:[#allocation4 + $0xa0] sm:$0xff]  ;;  %v1985_v34 = vcombine.high %v267_v31, %v271_v32  ;;  %v1984_v36 = vcombine.low %v267_v31, %v271_v32  ;;  %v261_v31 = vld [vmem:[#allocation4 + $0x158] sm:$0xff] }
 0x38a   :  { %v1951_v48 = vcombine.high %v234_v47, %v238_v27  ;;  %v1950_v49 = vcombine.low %v234_v47, %v238_v27  ;;  %v221_v47 = vld [vmem:[#allocation4 + $0x18] sm:$0xff]  ;;  %v2355_v27 = vmov 0  }
 0x38b   :  { %1607 = vmatprep.mubr.bf16.mxu0 %v2355_v27  ;;  %v1940_v51 = vcombine.low %v221_v47, %v225_v50  ;;  %v265_v32 = vld [vmem:[#allocation4 + $0x178] sm:$0xff] }
 0x38c   :  { %2163 = vmatpush3.bf16.msra.mxu1 %v2262_v33  ;;  %1579 = vmatprep.subr.bf16.mxu0 %v1951_v48  ;;  %v1976_v33 = vcombine.low %v259_v25, %v263_v26  ;;  %v1938_v48 = vcombine.low %v220_v45, %v224_v46  ;;  %v1973_v26 = vcombine.high %v253_v21, %v257_v22 }
 0x38d   :  { %1616 = vmatprep.subr.bf16.mxu1 %v1937_v44  ;;  %1580 = vmatpush1.bf16.msra.mxu0 %v1950_v49  ;;  %v1993_v44 = vcombine.high %v275_v39, %v279_v41  ;;  %v1939_v49 = vcombine.high %v220_v45, %v224_v46  ;;  %v1981_v37 = vcombine.high %v261_v31, %v265_v32  ;;  %v276_v46 = vld [vmem:[#allocation4 + $0x1d0] sm:$0xff] }
 0x38e   :  { %1581 = vmatprep.subr.bf16.mxu0 %v1959_v52  ;;  %v1941_v52 = vcombine.high %v221_v47, %v225_v50  ;;  %v280_v47 = vld [vmem:[#allocation4 + $0x1f0] sm:$0xff] }
 0x391   :  { %1582 = vmatpush1.bf16.msra.mxu0 %v1958_v53  ;;  %v1928_v53 = vld [vmem:[%s2558_s5 + $0x4] ss:$0 sm:$0xff] }
 0x392   :  { %1583 = vmatprep.subr.bf16.mxu0 %v1967_v56 }
 0x395   :  { %1584 = vmatpush1.bf16.msra.mxu0 %v1966_v57  ;;  %v228_v57 = vld [vmem:[#allocation4 + $0x50] sm:$0xff] }
 0x396   :  { %1585 = vmatprep.subr.bf16.mxu0 %v1975_v60  ;;  %v229_v60 = vld [vmem:[#allocation4 + $0x58] sm:$0xff]  ;;  %v1946_v7 = vcombine.low %v228_v57, %v232_v59 }
 0x399   :  { %1586 = vmatpush1.bf16.msra.mxu0 %v1974_v61  ;;  %v233_v61 = vld [vmem:[#allocation4 + $0x78] sm:$0xff] }
 0x39a   :  { %1587 = vmatprep.subr.bf16.mxu0 %v1983_v0  ;;  %v1948_v8 = vcombine.low %v229_v60, %v233_v61 }
 0x39d   :  { %1588 = vmatpush1.bf16.msra.mxu0 %v1982_v1  ;;  %v1947_v1 = vcombine.high %v228_v57, %v232_v59  ;;  %v287_v57 = vld [vmem:[%s2558_s5 + $0x5] sm:$0xff]  ;;  %v1229_v59 = vsub.s32 3, %v2420_v30 }
 0x39e   :  { %1589 = vmatprep.subr.bf16.mxu0 %v1991_v40  ;;  %v269_v40 = vld [vmem:[#allocation4 + $0x198] sm:$0xff] }
 0x3a1   :  { %1590 = vmatpush1.bf16.msra.mxu0 %v1990_v42 }
 0x3a2   :  { %1657 = vmatprep.subr.bf16.mxu0 %v1939_v49 }
 0x452   :  { %v1131_v3 = vpop.f32.mrb[12].mxu1 }
 0x453   :  { %v1132_v4 = vadd.f32 %v1924_v2, %v1131_v3  ;;  %v2154_v5 = vpop.f32.mrb[13].mxu1  ;;  %v1949_v2 = vcombine.high %v229_v60, %v233_v61  ;;  %v236_v3 = vld [vmem:[#allocation4 + $0x90] sm:$0xff] }
 0x454   :  { %v1134_v6 = vpop.f32.mrb[14].mxu1  ;;  %v237_v5 = vld [vmem:[#allocation4 + $0x98] sm:$0xff] }
 0x455   :  { %v1137_v9 = vmax.f32 %v1132_v4, 0.0  ;;  %v2155_v10 = vpop.f32.mrb[15].mxu1  ;;  %v240_v4 = vld [vmem:[#allocation4 + $0xb0] sm:$0xff]  ;;  %v241_v6 = vld [vmem:[#allocation4 + $0xb8] sm:$0xff] }
 0x456   :  { %v1957_v10 = vcombine.high %v237_v5, %v241_v6 }
 0x457   :  { %v1138_v11 = vpack.c.bf16 %v1137_v9, %v1137_v9  ;;  %v1955_v9 = vcombine.high %v236_v3, %v240_v4 }
 0x459   :  { %2165 = vmatmul.mubr.msk.bf16.vlgmr.msra.gmra.mrb[16].mxu1 %vm1020_vm1, %v1138_v11  ;;  %v244_v11 = vld [vmem:[#allocation4 + $0xd0] sm:$0xff] }
 0x45a   :  { %1617 = vmatpush1.bf16.msra.mxu1 %v1936_v43  ;;  %v1992_v43 = vcombine.low %v275_v39, %v279_v41  ;;  %1648 = vmatprep.mubr.bf16.mxu1 %v2355_v27  ;;  %v272_v39 = vld [vmem:[#allocation4 + $0x1b0] sm:$0xff]  ;;  %v273_v41 = vld [vmem:[#allocation4 + $0x1b8] sm:$0xff] }
 0x45b   :  { %1618 = vmatprep.subr.bf16.mxu1 %v1945_v12  ;;  %v248_v12 = vld [vmem:[#allocation4 + $0xf0] sm:$0xff]  ;;  %v1989_v45 = vcombine.high %v269_v40, %v273_v41  ;;  %v1986_v49 = vcombine.low %v268_v38, %v272_v39  ;;  %v1988_v50 = vcombine.low %v269_v40, %v273_v41 }
 0x45c   :  { %v1963_v17 = vcombine.high %v244_v11, %v248_v12 }
 0x45e   :  { %1619 = vmatpush1.bf16.msra.mxu1 %v1944_v15  ;;  %v1954_v15 = vcombine.low %v236_v3, %v240_v4 }
 0x45f   :  { %1620 = vmatprep.subr.bf16.mxu1 %v1953_v16  ;;  %v1956_v16 = vcombine.low %v237_v5, %v241_v6 }
 0x462   :  { %1621 = vmatpush1.bf16.msra.mxu1 %v1952_v19  ;;  %v252_v19 = vld [vmem:[#allocation4 + $0x110] sm:$0xff] }
 0x463   :  { %1622 = vmatprep.subr.bf16.mxu1 %v1961_v20  ;;  %v256_v20 = vld [vmem:[#allocation4 + $0x130] sm:$0xff] }
 0x464   :  { %v1971_v25 = vcombine.high %v252_v19, %v256_v20 }
 0x466   :  { %1623 = vmatpush1.bf16.msra.mxu1 %v1960_v23  ;;  %v1962_v23 = vcombine.low %v244_v11, %v248_v12 }
 0x467   :  { %1624 = vmatprep.subr.bf16.mxu1 %v1969_v24  ;;  %v1964_v24 = vcombine.low %v245_v13, %v249_v14 }
 0x46a   :  { %1625 = vmatpush1.bf16.msra.mxu1 %v1968_v28  ;;  %v260_v28 = vld [vmem:[#allocation4 + $0x150] sm:$0xff] }
 0x46b   :  { %1626 = vmatprep.subr.bf16.mxu1 %v1977_v29  ;;  %v264_v29 = vld [vmem:[#allocation4 + $0x170] sm:$0xff] }
 0x46c   :  { %v1978_v42 = vcombine.low %v260_v28, %v264_v29 }
 0x46e   :  { %1627 = vmatpush1.bf16.msra.mxu1 %v1976_v33  ;;  %v1970_v33 = vcombine.low %v252_v19, %v256_v20 }
 0x46f   :  { %1628 = vmatprep.subr.bf16.mxu1 %v1985_v34  ;;  %v1972_v34 = vcombine.low %v253_v21, %v257_v22 }
 0x472   :  { %1629 = vmatpush1.bf16.msra.mxu1 %v1984_v36  ;;  %v1979_v36 = vcombine.high %v260_v28, %v264_v29  ;;  %v1245_v28 = vsub.s32 7, %v2420_v30 }
 0x473   :  { %1630 = vmatprep.subr.bf16.mxu1 %v1993_v44  ;;  %v1987_v44 = vcombine.high %v268_v38, %v272_v39 }
 0x476   :  { %1631 = vmatpush1.bf16.msra.mxu1 %v1992_v43  ;;  %v1980_v43 = vcombine.low %v261_v31, %v265_v32 }
 0x477   :  { %1698 = vmatprep.subr.bf16.mxu1 %v1941_v52 }
 0x52c   :  { %v1206_v54 = vpop.f32.mrb[16].mxu1 }
 0x52d   :  { %v1207_v55 = vadd.f32 %v1928_v53, %v1206_v54  ;;  %v2166_v56 = vpop.f32.mrb[17].mxu1  ;;  %v1994_v53 = vcombine.low %v276_v46, %v280_v47 }
 0x52e   :  { %v1209_v58 = vpop.f32.mrb[18].mxu1  ;;  %v1225_v56 = vsub.s32 2, %v2420_v30 }
 0x52f   :  { %v1212_v62 = vmax.f32 %v1207_v55, 0.0  ;;  %v2167_v63 = vpop.f32.mrb[19].mxu1  ;;  %v1217_v55 = vsub.s32 0, %v2420_v30  ;;  %v1221_v58 = vsub.s32 1, %v2420_v30 }
 0x530   :  { %v1226_v61 = vrot.slane %v287_v57, %v1225_v56  ;;  %v1230_v63 = vrot.slane %v287_v57, %v1229_v59 }
 0x531   :  { %v2526_v0 = vpack.c.bf16 %v1212_v62, %v1212_v62  ;;  %v1218_v60 = vrot.slane %v287_v57, %v1217_v55  ;;  %v1222_v62 = vrot.slane %v287_v57, %v1221_v58 }
 0x533   :  { %1608 = vmatmul.mubr.bf16.vlgmr.msra.gmra.mrb[12].mxu0 %v2526_v0  ;;  %1649 = vmatmul.mubr.bf16.vlgmr.msra.gmra.mrb[20].mxu1 %v2526_v0 }
 0x534   :  { %1658 = vmatpush1.bf16.msra.mxu0 %v1938_v48  ;;  %1699 = vmatpush1.bf16.msra.mxu1 %v1940_v51  ;;  %v281_v48 = vld [vmem:[#allocation4 + $0x1f8] sm:$0xff]  ;;  %v1995_v51 = vcombine.high %v276_v46, %v280_v47 }
 0x535   :  { %1659 = vmatprep.subr.bf16.mxu0 %v1947_v1  ;;  %1700 = vmatprep.subr.bf16.mxu1 %v1949_v2 }
 0x536   :  { %1689 = vmatprep.mubr.bf16.mxu0 %v2355_v27  ;;  %1730 = vmatprep.mubr.bf16.mxu1 %v2355_v27  ;;  %v277_v27 = vld [vmem:[#allocation4 + $0x1d8] sm:$0xff] }
 0x537   :  { %v1997_v52 = vcombine.high %v277_v27, %v281_v48  ;;  %v1996_v54 = vcombine.low %v277_v27, %v281_v48 }
 0x538   :  { %1660 = vmatpush1.bf16.msra.mxu0 %v1946_v7  ;;  %1701 = vmatpush1.bf16.msra.mxu1 %v1948_v8 }
 0x539   :  { %1661 = vmatprep.subr.bf16.mxu0 %v1955_v9  ;;  %1702 = vmatprep.subr.bf16.mxu1 %v1957_v10 }
 0x53c   :  { %1662 = vmatpush1.bf16.msra.mxu0 %v1954_v15  ;;  %1703 = vmatpush1.bf16.msra.mxu1 %v1956_v16 }
 0x53d   :  { %1663 = vmatprep.subr.bf16.mxu0 %v1963_v17  ;;  %1704 = vmatprep.subr.bf16.mxu1 %v1965_v18 }
 0x540   :  { %1664 = vmatpush1.bf16.msra.mxu0 %v1962_v23  ;;  %1705 = vmatpush1.bf16.msra.mxu1 %v1964_v24  ;;  %v1233_v24 = vsub.s32 4, %v2420_v30 }
 0x541   :  { %1665 = vmatprep.subr.bf16.mxu0 %v1971_v25  ;;  %1706 = vmatprep.subr.bf16.mxu1 %v1973_v26  ;;  %v1241_v25 = vsub.s32 6, %v2420_v30  ;;  %v1237_v26 = vsub.s32 5, %v2420_v30 }
 0x542   :  { %v1234_v32 = vrot.slane %v287_v57, %v1233_v24 }
 0x544   :  { %1666 = vmatpush1.bf16.msra.mxu0 %v1970_v33  ;;  %1707 = vmatpush1.bf16.msra.mxu1 %v1972_v34  ;;  %v1242_v33 = vrot.slane %v287_v57, %v1241_v25 }
 0x545   :  { %1667 = vmatprep.subr.bf16.mxu0 %v1979_v36  ;;  %1708 = vmatprep.subr.bf16.mxu1 %v1981_v37  ;;  %v1238_v36 = vrot.slane %v287_v57, %v1237_v26  ;;  %v1246_v37 = vrot.slane %v287_v57, %v1245_v28 }
 0x548   :  { %1668 = vmatpush1.bf16.msra.mxu0 %v1978_v42  ;;  %1709 = vmatpush1.bf16.msra.mxu1 %v1980_v43 }
 0x549   :  { %1669 = vmatprep.subr.bf16.mxu0 %v1987_v44  ;;  %1710 = vmatprep.subr.bf16.mxu1 %v1989_v45 }
 0x54c   :  { %1670 = vmatpush1.bf16.msra.mxu0 %v1986_v49  ;;  %1711 = vmatpush1.bf16.msra.mxu1 %v1988_v50 }
 0x54d   :  { %1671 = vmatprep.subr.bf16.mxu0 %v1995_v51  ;;  %1712 = vmatprep.subr.bf16.mxu1 %v1997_v52 }
 0x550   :  { %1672 = vmatpush1.bf16.msra.mxu0 %v1994_v53  ;;  %1713 = vmatpush1.bf16.msra.mxu1 %v1996_v54 }
 0x553   :  { %1690 = vmatmul.mubr.bf16.vlgmr.msra.gmra.mrb[16].mxu0 %v2526_v0  ;;  %1731 = vmatmul.mubr.bf16.vlgmr.msra.gmra.mrb[24].mxu1 %v2526_v0 }
 0x606   :  { %v1609_v1 = vpop.f32.mrb[12].mxu0  ;;  %v1650_v2 = vpop.f32.mrb[20].mxu1 }
 0x607   :  { %v1610_v3 = vadd.f32 %v1609_v1, %v1218_v60  ;;  %v1651_v0 = vadd.f32 %v1650_v2, %v1226_v61  ;;  %v1611_v4 = vpop.f32.mrb[13].mxu0  ;;  %v1652_v5 = vpop.f32.mrb[21].mxu1 }
 0x608   :  { %v1612_v6 = vadd.f32 %v1611_v4, %v1222_v62  ;;  %v1653_v7 = vadd.f32 %v1652_v5, %v1230_v63  ;;  %v1613_v8 = vpop.f32.mrb[14].mxu0  ;;  %v1654_v9 = vpop.f32.mrb[22].mxu1 }
 0x609   :  { %v1998_v10 = vmul.f32 -1.442695, %v1610_v3  ;;  %v2000_v11 = vmul.f32 -1.442695, %v1651_v0  ;;  %v1614_v12 = vpop.f32.mrb[15].mxu0  ;;  %v1655_v13 = vpop.f32.mrb[23].mxu1 }
 0x60a   :  { %v1999_v14 = vmul.f32 -1.442695, %v1612_v6  ;;  %v2001_v15 = vmul.f32 -1.442695, %v1653_v7 }
 0x60b   :  { %2265 = vpow2.f32 %v1998_v10 }
 0x60c   :  { %2267 = vpow2.f32 %v2000_v11 }
 0x60d   :  { %2269 = vpow2.f32 %v1999_v14 }
 0x60e   :  { %2271 = vpow2.f32 %v2001_v15 }
 0x615   :  { %v2266_v16 = vpop.eup %2265 }
 0x616   :  { %v2268_v17 = vpop.eup %2267  ;;  %v1763_v18 = vadd.f32 1.0, %v2266_v16 }
 0x617   :  { %v2270_v19 = vpop.eup %2269  ;;  %v1765_v20 = vadd.f32 1.0, %v2268_v17 }
 0x618   :  { %v2272_v21 = vpop.eup %2271  ;;  %2273 = vrcp.f32 %v1763_v18  ;;  %v1764_v22 = vadd.f32 1.0, %v2270_v19 }
 0x619   :  { %2275 = vrcp.f32 %v1765_v20  ;;  %v1766_v23 = vadd.f32 1.0, %v2272_v21 }
 0x61a   :  { %2277 = vrcp.f32 %v1764_v22 }
 0x61b   :  { %2279 = vrcp.f32 %v1766_v23 }
 0x622   :  { %v2274_v29 = vpop.eup %2273 }
 0x623   :  { %v2276_v31 = vpop.eup %2275 }
 0x624   :  { %v2278_v34 = vpop.eup %2277 }
 0x625   :  { %v2280_v38 = vpop.eup %2279  ;;  %v1795_v39 = vcombine.low %v2274_v29, %v2278_v34 }
 0x626   :  { %v1796_v40 = vcombine.low %v2276_v31, %v2280_v38  ;;  %v1691_v41 = vpop.f32.mrb[16].mxu0  ;;  %v1732_v42 = vpop.f32.mrb[24].mxu1 }
 0x627   :  { %v1803_v43 = vrot.slane %v1795_v39, %v2423_v35  ;;  %v1692_v44 = vadd.f32 %v1691_v41, %v1234_v32  ;;  %v1733_v45 = vadd.f32 %v1732_v42, %v1242_v33  ;;  %v1693_v46 = vpop.f32.mrb[17].mxu0  ;;  %v1734_v47 = vpop.f32.mrb[25].mxu1 }
 0x628   :  { %v1810_v30 = vrot.slane %v1796_v40, %v2423_v35  ;;  %v1694_v27 = vadd.f32 %v1693_v46, %v1238_v36  ;;  %v1735_v48 = vadd.f32 %v1734_v47, %v1246_v37  ;;  %v1695_v49 = vpop.f32.mrb[18].mxu0  ;;  %v1736_v50 = vpop.f32.mrb[26].mxu1 }
 0x629   :  { %v2002_v51 = vmul.f32 -1.442695, %v1692_v44  ;;  %v2004_v52 = vmul.f32 -1.442695, %v1733_v45  ;;  %v1696_v53 = vpop.f32.mrb[19].mxu0  ;;  %v1737_v54 = vpop.f32.mrb[27].mxu1 }
 0x62a   :  { %v1811_v55 = vcombine.low %v1803_v43, %v1810_v30  ;;  %v2003_v56 = vmul.f32 -1.442695, %v1694_v27  ;;  %v2005_v57 = vmul.f32 -1.442695, %v1735_v48 }
 0x62b   :  { %2281 = vpow2.f32 %v2002_v51 }
 0x62c   :  { %1831 = vst [vmem:[%s2559_s6] sm:$0xff] %v1811_v55  ;;  %2283 = vpow2.f32 %v2004_v52 }
 0x62d   :  { %2285 = vpow2.f32 %v2003_v56 }
 0x62e   :  { %2287 = vpow2.f32 %v2005_v57 }
 0x635   :  { %v2282_v58 = vpop.eup %2281 }
 0x636   :  { %v2284_v59 = vpop.eup %2283  ;;  %v1767_v60 = vadd.f32 1.0, %v2282_v58 }
 0x637   :  { %v2286_v61 = vpop.eup %2285  ;;  %v1769_v62 = vadd.f32 1.0, %v2284_v59 }
 0x638   :  { %v2288_v63 = vpop.eup %2287  ;;  %2289 = vrcp.f32 %v1767_v60  ;;  %v1768_v1 = vadd.f32 1.0, %v2286_v61 }
 0x639   :  { %2291 = vrcp.f32 %v1769_v62  ;;  %v1770_v2 = vadd.f32 1.0, %v2288_v63 }
 0x63a   :  { %2293 = vrcp.f32 %v1768_v1 }
 0x63b   :  { %2295 = vrcp.f32 %v1770_v2 }
 0x642   :  { %v2290_v3 = vpop.eup %2289 }
 0x643   :  { %v2292_v0 = vpop.eup %2291 }
 0x644   :  { %v2294_v4 = vpop.eup %2293 }
 0x645   :  { %v2296_v5 = vpop.eup %2295  ;;  %v1812_v6 = vcombine.low %v2290_v3, %v2294_v4 }
 0x646   :  { %v1813_v7 = vcombine.low %v2292_v0, %v2296_v5 }
 0x647   :  { %v1820_v8 = vrot.slane %v1812_v6, %v2423_v35 }
 0x648   :  { %v1827_v9 = vrot.slane %v1813_v7, %v2423_v35 }
 0x64a   :  { %v1828_v10 = vcombine.low %v1820_v8, %v1827_v9 }
 0x64c   :  { %1832 = vst [vmem:[%s2559_s6 + $0x8] sm:$0xff] %v1828_v10 }
 0x64d   :  { %1842 = vsyncpa [#allocation3], 1 }
 0x64e   :  { %1843 = vsyncpa [#allocation5], 1 }

</bundles_post_ra>
